<compile_context>
chip_gen: v7x
topology: tpu7x:2x2x1
jax: 0.10.0
libtpu: 0.0.40
codegen_flags: <defaults>
</compile_context>

<pallas_src>
import functools

import jax
import jax.numpy as jnp
from jax.experimental import pallas as pl
from jax.experimental.pallas import tpu as pltpu


def _lwr_dist_kernel(x_ref, xsq_ref, db_ref, dsq_ref, out_ref, *, inv_d):
    # x_ref  : (TN, D)   query tile
    # xsq_ref: (TN, 1)   precomputed ||x||^2 per query row
    # db_ref : (TM, D)   database tile
    # dsq_ref: (1, TM)   precomputed ||db||^2 per db row
    # out_ref: (TN, TM)  mean-squared-error distances
    cross = jax.lax.dot_general(                       # (TN, TM) on the MXU,
        x_ref[...], db_ref[...],                       # contracting last-on-last:
        dimension_numbers=(((1,), (1,)), ((), ())),    # no explicit transpose of db.
        preferred_element_type=jnp.float32,
    )
    dist = (xsq_ref[...] + dsq_ref[...] - 2.0 * cross) * inv_d
    out_ref[...] = jnp.maximum(dist, 0.0)              # guard f32 cancellation


def _round_up(v, m):
    return (v + m - 1) // m * m


@functools.partial(jax.jit, static_argnames=("tn", "tm"))
def lwr_distances(x, db, *, tn=128, tm=512):
    """Pairwise MSE distance matrix dist[i, j] = mean((x[i] - db[j])**2)."""
    n, d_feat = x.shape
    m, d_feat2 = db.shape
    assert d_feat == d_feat2

    x = x.astype(jnp.float32)
    db = db.astype(jnp.float32)

    # Clamp tiles to the (padded) problem size while keeping MXU/lane alignment:
    # sublane multiples of 8 for the query axis, lane multiples of 128 for the db axis.
    tn = min(tn, _round_up(n, 8))
    tm = min(tm, _round_up(m, 128))
    n_pad = _round_up(n, tn)
    m_pad = _round_up(m, tm)

    if n_pad != n:
        x = jnp.pad(x, ((0, n_pad - n), (0, 0)))
    if m_pad != m:
        db = jnp.pad(db, ((0, m_pad - m), (0, 0)))

    # Hoist the norm reductions out of the kernel (computed once, not per tile).
    xsq = jnp.sum(x * x, axis=-1, keepdims=True)           # (n_pad, 1)
    dsq = jnp.sum(db * db, axis=-1, keepdims=True).T        # (1, m_pad)

    grid = (n_pad // tn, m_pad // tm)
    kernel = functools.partial(_lwr_dist_kernel, inv_d=1.0 / d_feat)

    dist = pl.pallas_call(
        kernel,
        out_shape=jax.ShapeDtypeStruct((n_pad, m_pad), jnp.float32),
        grid_spec=pltpu.PrefetchScalarGridSpec(
            num_scalar_prefetch=0,
            grid=grid,
            in_specs=[
                pl.BlockSpec((tn, d_feat), lambda i, j: (i, 0)),   # x tile
                pl.BlockSpec((tn, 1), lambda i, j: (i, 0)),        # ||x||^2
                pl.BlockSpec((tm, d_feat), lambda i, j: (j, 0)),   # db tile
                pl.BlockSpec((1, tm), lambda i, j: (0, j)),        # ||db||^2
            ],
            out_specs=pl.BlockSpec((tn, tm), lambda i, j: (i, j)),
        ),
        compiler_params=pltpu.CompilerParams(
            dimension_semantics=("parallel", "parallel"),
        ),
    )(x, xsq, db, dsq)

    return dist[:n, :m]


class LWRLayer:
    """JAX/Pallas analogue of the (incomplete) PyTorch LWRLayer."""

    def __init__(self, n_neighbours=100, db=None):
        self.n_neighbours = n_neighbours
        self.db = db                      # [M, D] database of stored samples
        self.linear_approx = None         # never defined/used in the reference module

    def forward(self, x):
        # For every row of X: MSE distance to every db row, then the
        # n_neighbours smallest (torch.topk(..., largest=False)).
        dist = lwr_distances(x, self.db)                      # (N, M) — Pallas hot path
        k = min(self.n_neighbours, self.db.shape[0])
        neg_vals, indices = jax.lax.top_k(-dist, k)           # smallest-k
        return dist, indices, -neg_vals

    __call__ = forward


if __name__ == "__main__":
    key = jax.random.PRNGKey(0)
    k_x, k_db = jax.random.split(key)

    N, D, M = 16, 32, 256        # small shapes: 16 query rows, 32 features, 256 db rows
    n_neighbours = 4

    x = jax.random.normal(k_x, (N, D), dtype=jnp.float32)
    db = jax.random.normal(k_db, (M, D), dtype=jnp.float32)   # deterministic "parameter"

    layer = LWRLayer(n_neighbours=n_neighbours, db=db)
    dist, indices, knn_dists = layer(x)
    jax.block_until_ready((dist, indices, knn_dists))

    # Correctness check against a pure-JAX reference.
    ref = jnp.mean((x[:, None, :] - db[None, :, :]) ** 2, axis=-1)
    assert dist.shape == (N, M), "distance shape mismatch"
    assert jnp.allclose(dist, ref, atol=1e-4, rtol=1e-4), "distance mismatch"
    ref_idx = jax.lax.top_k(-ref, n_neighbours)[1]
    assert jnp.array_equal(indices, ref_idx), "neighbour index mismatch"

    print("KERNEL_OK")
</pallas_src>

<mosaic_0001>
module attributes {stable_mosaic.version = 11 : i64} {
  func.func @_lwr_dist_kernel(%arg0: i32, %arg1: i32, %arg2: memref<16x32xf32, #tpu.memory_space<vmem>>, %arg3: memref<16x1xf32, #tpu.memory_space<vmem>>, %arg4: memref<256x32xf32, #tpu.memory_space<vmem>>, %arg5: memref<1x256xf32, #tpu.memory_space<vmem>>, %arg6: memref<16x256xf32, #tpu.memory_space<vmem>>) attributes {dimension_semantics = [#tpu.dimension_semantics<parallel>, #tpu.dimension_semantics<parallel>], iteration_bounds = array<i64: 1, 1>, scalar_prefetch = 0 : i64, scratch_operands = 0 : i64, tpu.core_type = #tpu.core_type<tc>, window_params = [{transform_indices = @transform_0, window_bounds = array<i64: 16, 32>}, {transform_indices = @transform_1, window_bounds = array<i64: 16, 1>}, {transform_indices = @transform_2, window_bounds = array<i64: 256, 32>}, {transform_indices = @transform_3, window_bounds = array<i64: 1, 256>}, {transform_indices = @transform_4, window_bounds = array<i64: 16, 256>}]} {
    %c0 = arith.constant 0 : index
    %c0_0 = arith.constant 0 : index
    %0 = vector.load %arg2[%c0, %c0_0] : memref<16x32xf32, #tpu.memory_space<vmem>>, vector<16x32xf32>
    %c0_1 = arith.constant 0 : index
    %c0_2 = arith.constant 0 : index
    %1 = vector.load %arg4[%c0_1, %c0_2] : memref<256x32xf32, #tpu.memory_space<vmem>>, vector<256x32xf32>
    %cst = arith.constant dense<0.000000e+00> : vector<16x256xf32>
    %2 = tpu.matmul %0, %1, %cst {dimension_numbers = #tpu.dot_dimension_numbers<[1], [1], [0], [0], [0, 0, 1, 0], [], []>} : vector<16x32xf32>, vector<256x32xf32>, vector<16x256xf32> -> vector<16x256xf32>
    %c0_3 = arith.constant 0 : index
    %c0_4 = arith.constant 0 : index
    %3 = vector.load %arg3[%c0_3, %c0_4] : memref<16x1xf32, #tpu.memory_space<vmem>>, vector<16x1xf32>
    %c0_5 = arith.constant 0 : index
    %c0_6 = arith.constant 0 : index
    %4 = vector.load %arg5[%c0_5, %c0_6] : memref<1x256xf32, #tpu.memory_space<vmem>>, vector<1x256xf32>
    %5 = vector.broadcast %3 : vector<16x1xf32> to vector<16x256xf32>
    %6 = vector.broadcast %4 : vector<1x256xf32> to vector<16x256xf32>
    %7 = arith.addf %5, %6 : vector<16x256xf32>
    %cst_7 = arith.constant 2.000000e+00 : f32
    %8 = vector.broadcast %cst_7 : f32 to vector<16x256xf32>
    %9 = arith.mulf %8, %2 : vector<16x256xf32>
    %10 = arith.subf %7, %9 : vector<16x256xf32>
    %cst_8 = arith.constant 3.125000e-02 : f32
    %11 = vector.broadcast %cst_8 : f32 to vector<16x256xf32>
    %12 = arith.mulf %10, %11 : vector<16x256xf32>
    %cst_9 = arith.constant 0.000000e+00 : f32
    %13 = vector.broadcast %cst_9 : f32 to vector<16x256xf32>
    %14 = arith.maximumf %12, %13 : vector<16x256xf32>
    %c0_10 = arith.constant 0 : index
    %c0_11 = arith.constant 0 : index
    %15 = vector.load %arg6[%c0_10, %c0_11] : memref<16x256xf32, #tpu.memory_space<vmem>>, vector<16x256xf32>
    tpu.vector_store %arg6[%c0_10, %c0_11], %14 {strides = array<i32>} : memref<16x256xf32, #tpu.memory_space<vmem>>, vector<16x256xf32>,
    return
  }
  func.func @transform_0(%arg0: i32, %arg1: i32) -> (i32, i32) {
    %c0_i32 = arith.constant 0 : i32
    %c0_i32_0 = arith.constant 0 : i32
    return %arg0, %c0_i32 : i32, i32
  }
  func.func @transform_1(%arg0: i32, %arg1: i32) -> (i32, i32) {
    %c0_i32 = arith.constant 0 : i32
    %c0_i32_0 = arith.constant 0 : i32
    return %arg0, %c0_i32 : i32, i32
  }
  func.func @transform_2(%arg0: i32, %arg1: i32) -> (i32, i32) {
    %c0_i32 = arith.constant 0 : i32
    %c0_i32_0 = arith.constant 0 : i32
    return %arg1, %c0_i32 : i32, i32
  }
  func.func @transform_3(%arg0: i32, %arg1: i32) -> (i32, i32) {
    %c0_i32 = arith.constant 0 : i32
    %c0_i32_0 = arith.constant 0 : i32
    return %c0_i32, %arg1 : i32, i32
  }
  func.func @transform_4(%arg0: i32, %arg1: i32) -> (i32, i32) {
    %c0_i32 = arith.constant 0 : i32
    return %arg0, %arg1 : i32, i32
  }
}

</mosaic_0001>

<bundles_post_ra>
// kernel: lwr_distances.1
= control target key start
LH: loop header
LB: loop body
LE: loop exit
PB: predicated region body
PF: predicated region fallthrough
CT: control target
= control target key end

     0   :  { %vm52_vm0 = vcmask 261120   ;;  %v459_v7 = vmov 0   ;;  %s693_s0 = inlined_call_operand.vmem [shape: f32[16,32], index: 0, kind: input, shape index: {}]   ;;  %s694_s1 = inlined_call_operand.vmem [shape: f32[16,1], index: 1, kind: input, shape index: {}]   ;;  %s695_s2 = inlined_call_operand.vmem [shape: f32[256,32], index: 2, kind: input, shape index: {}]   ;;  %s696_s3 = inlined_call_operand.vmem [shape: f32[1,256], index: 3, kind: input, shape index: {}]   ;;  %s697_s4 = inlined_call_operand.hbm [shape: f32[16,256], index: 4, kind: output, shape index: {}]  }
   0x1   :  { %v36_v0 = vld [vmem:[%s695_s2 + $0x80] sm:$0xff]  ;;  %v37_v1 = vld [vmem:[%s695_s2 + $0x88] sm:$0xff]  ;;  %vm499_vm1 = vmpackc.low %vm52_vm0, %vm52_vm0  ;;  %434 = vset.pattern.permute.xlu0 %v459_v7 }
   0x2   :  { %v20_v2 = vld [vmem:[%s695_s2] sm:$0xff]  ;;  %v366_v3 = vpack.c.bf16 %v37_v1, %v36_v0  ;;  %v21_v5 = vld [vmem:[%s695_s2 + $0x8] sm:$0xff]  ;;  %v38_v6 = vld [vmem:[%s695_s2 + $0x90] sm:$0xff] }
   0x3   :  { %v369_v8 = vpack.c.bf16 %v21_v5, %v20_v2  ;;  %v39_v9 = vld [vmem:[%s695_s2 + $0x98] sm:$0xff]  ;;  %v22_v11 = vld [vmem:[%s695_s2 + $0x10] sm:$0xff]  ;;  %v40_v13 = vld [vmem:[%s695_s2 + $0xa0] sm:$0xff] }
   0x4   :  { %368 = vmatprep.subr.msk.bf16.mxu0 %vm499_vm1, %v366_v3  ;;  %414 = vmatprep.subr.msk.bf16.mxu1 %vm499_vm1, %v366_v3  ;;  %v372_v10 = vpack.c.bf16 %v39_v9, %v38_v6  ;;  %v23_v12 = vld [vmem:[%s695_s2 + $0x18] sm:$0xff]  ;;  %v41_v14 = vld [vmem:[%s695_s2 + $0xa8] sm:$0xff]  ;;  %v539_v17 = vld [vmem:[%s693_s0] sm:$0xff] }
   0x5   :  { %371 = vmatpush3.bf16.xpose.msk.msra.mxu0 %vm499_vm1, %v369_v8  ;;  %422 = vmatpush3.bf16.xpose.msk.msra.mxu1 %vm499_vm1, %v369_v8  ;;  %v375_v15 = vpack.c.bf16 %v23_v12, %v22_v11  ;;  %v378_v16 = vpack.c.bf16 %v41_v14, %v40_v13  ;;  %v544_v18 = vld [vmem:[%s693_s0 + $0x8] sm:$0xff]  ;;  %v232_v19 = vld [vmem:[%s694_s1] sm:$0xff] }
   0x6   :  { %374 = vmatprep.subr.msk.bf16.mxu0 %vm499_vm1, %v372_v10  ;;  %415 = vmatprep.subr.msk.bf16.mxu1 %vm499_vm1, %v372_v10 }
   0xd   :  { %377 = vmatpush3.bf16.xpose.msk.msra.mxu0 %vm499_vm1, %v375_v15  ;;  %423 = vmatpush3.bf16.xpose.msk.msra.mxu1 %vm499_vm1, %v375_v15 }
   0xe   :  { %9 = vsyncpa [#allocation3], 0  ;;  %380 = vmatprep.subr.msk.bf16.mxu0 %vm499_vm1, %v378_v16  ;;  %416 = vmatprep.subr.msk.bf16.mxu1 %vm499_vm1, %v378_v16  ;;  %v24_v20 = vld [vmem:[%s695_s2 + $0x20] sm:$0xff]  ;;  %v25_v21 = vld [vmem:[%s695_s2 + $0x28] sm:$0xff]  ;;  %v246_v54 = vlaneseq }
   0xf   :  { %v42_v22 = vld [vmem:[%s695_s2 + $0xb0] sm:$0xff]  ;;  %v43_v23 = vld [vmem:[%s695_s2 + $0xb8] sm:$0xff]  ;;  %362 = vmatprep.mubr.msk.f32.mxu0 %vm52_vm0, %v539_v17  ;;  %364 = vmatprep.mubr.msk.f32.mxu1 %vm52_vm0, %v544_v18  ;;  %v381_v24 = vpack.c.bf16 %v25_v21, %v24_v20  ;;  %v233_v25 = vld [vmem:[%s694_s1 + $0x8] sm:$0xff] }
  0x10   :  { %237 = vperm.xlu0 %434, %v232_v19   ;;  %v384_v26 = vpack.c.bf16 %v43_v23, %v42_v22  ;;  %v26_v27 = vld [vmem:[%s695_s2 + $0x30] sm:$0xff]  ;;  %v27_v28 = vld [vmem:[%s695_s2 + $0x38] sm:$0xff]  ;;  %v44_v29 = vld [vmem:[%s695_s2 + $0xc0] sm:$0xff]  ;;  %v247_v55 = vshrl.u32 %v246_v54, 7 }
  0x11   :  { %v45_v30 = vld [vmem:[%s695_s2 + $0xc8] sm:$0xff]  ;;  %v387_v31 = vpack.c.bf16 %v27_v28, %v26_v27  ;;  %v28_v33 = vld [vmem:[%s695_s2 + $0x40] sm:$0xff]  ;;  %v46_v35 = vld [vmem:[%s695_s2 + $0xd0] sm:$0xff] }
  0x12   :  { %v390_v32 = vpack.c.bf16 %v45_v30, %v44_v29  ;;  %v29_v34 = vld [vmem:[%s695_s2 + $0x48] sm:$0xff]  ;;  %v47_v36 = vld [vmem:[%s695_s2 + $0xd8] sm:$0xff]  ;;  %v30_v39 = vld [vmem:[%s695_s2 + $0x50] sm:$0xff]  ;;  %v248_v57 = vsub.s32 0, %v247_v55  ;;  %v252_v59 = vsub.s32 1, %v247_v55 }
  0x13   :  { %v393_v37 = vpack.c.bf16 %v29_v34, %v28_v33  ;;  %v396_v38 = vpack.c.bf16 %v47_v36, %v46_v35  ;;  %v31_v40 = vld [vmem:[%s695_s2 + $0x58] sm:$0xff]  ;;  %v48_v41 = vld [vmem:[%s695_s2 + $0xe0] sm:$0xff]  ;;  %v49_v42 = vld [vmem:[%s695_s2 + $0xe8] sm:$0xff] }
  0x14   :  { %242 = vperm.xlu0 %434, %v233_v25   ;;  %v399_v43 = vpack.c.bf16 %v31_v40, %v30_v39  ;;  %v402_v44 = vpack.c.bf16 %v49_v42, %v48_v41  ;;  %v32_v45 = vld [vmem:[%s695_s2 + $0x60] sm:$0xff]  ;;  %v33_v46 = vld [vmem:[%s695_s2 + $0x68] sm:$0xff]  ;;  %v50_v47 = vld [vmem:[%s695_s2 + $0xf0] sm:$0xff] }
  0x15   :  { %383 = vmatpush3.bf16.xpose.msk.msra.mxu0 %vm499_vm1, %v381_v24  ;;  %424 = vmatpush3.bf16.xpose.msk.msra.mxu1 %vm499_vm1, %v381_v24  ;;  %v51_v48 = vld [vmem:[%s695_s2 + $0xf8] sm:$0xff]  ;;  %v405_v49 = vpack.c.bf16 %v33_v46, %v32_v45  ;;  %v34_v51 = vld [vmem:[%s695_s2 + $0x70] sm:$0xff]  ;;  %v234_v58 = vld [vmem:[%s696_s3] sm:$0x3] }
  0x16   :  { %386 = vmatprep.subr.msk.bf16.mxu0 %vm499_vm1, %v384_v26  ;;  %417 = vmatprep.subr.msk.bf16.mxu1 %vm499_vm1, %v384_v26  ;;  %v408_v50 = vpack.c.bf16 %v51_v48, %v50_v47  ;;  %v35_v52 = vld [vmem:[%s695_s2 + $0x78] sm:$0xff]  ;;  %v249_v60 = vrot.slane %v234_v58, %v248_v57  ;;  %v253_v61 = vrot.slane %v234_v58, %v252_v59  ;;  %s460_s2 = smov [#allocation2]  }
  0x17   :  { %v411_v53 = vpack.c.bf16 %v35_v52, %v34_v51  ;;  %s285_s3 = sshll.u32 %s460_s2, 4  ;;  %s286_s3 = int_to_ptr.vmem [resolvable:$true] %s285_s3 }
  0x18   :  { %s435_s7 = scalar_lea.vmem %s286_s3, 512  ;;  %p440_p1 = scmp.lt.s32.totalorder %s286_s3, %s286_s3 }
  0x19   :  { %p436_p0 = scmp.ne.s32.totalorder %s286_s3, %s435_s7  ;;  %p441_p2 = scmp.lt.s32.totalorder %s435_s7, %s435_s7 }
  0x1b   :  { %p442_p3 = por %p441_p2, %p440_p1 }
  0x1d   :  { %389 = vmatpush3.bf16.xpose.msk.msra.mxu0 %vm499_vm1, %v387_v31  ;;  %425 = vmatpush3.bf16.xpose.msk.msra.mxu1 %vm499_vm1, %v387_v31  ;;  %p443_p4 = pnand %p442_p3, %p436_p0 }
  0x1e   :  { %392 = vmatprep.subr.msk.bf16.mxu0 %vm499_vm1, %v390_v32  ;;  %418 = vmatprep.subr.msk.bf16.mxu1 %vm499_vm1, %v390_v32 }
  0x25   :  { %395 = vmatpush3.bf16.xpose.msk.msra.mxu0 %vm499_vm1, %v393_v37  ;;  %426 = vmatpush3.bf16.xpose.msk.msra.mxu1 %vm499_vm1, %v393_v37 }
  0x26   :  { %398 = vmatprep.subr.msk.bf16.mxu0 %vm499_vm1, %v396_v38  ;;  %419 = vmatprep.subr.msk.bf16.mxu1 %vm499_vm1, %v396_v38 }
  0x2d   :  { %401 = vmatpush3.bf16.xpose.msk.msra.mxu0 %vm499_vm1, %v399_v43  ;;  %427 = vmatpush3.bf16.xpose.msk.msra.mxu1 %vm499_vm1, %v399_v43 }
  0x2e   :  { %404 = vmatprep.subr.msk.bf16.mxu0 %vm499_vm1, %v402_v44  ;;  %420 = vmatprep.subr.msk.bf16.mxu1 %vm499_vm1, %v402_v44 }
  0x35   :  { %407 = vmatpush3.bf16.xpose.msk.msra.mxu0 %vm499_vm1, %v405_v49  ;;  %428 = vmatpush3.bf16.xpose.msk.msra.mxu1 %vm499_vm1, %v405_v49 }
  0x36   :  { %410 = vmatprep.subr.msk.bf16.mxu0 %vm499_vm1, %v408_v50  ;;  %421 = vmatprep.subr.msk.bf16.mxu1 %vm499_vm1, %v408_v50 }
  0x3d   :  { %413 = vmatpush3.bf16.xpose.msk.msra.mxu0 %vm499_vm1, %v411_v53  ;;  %429 = vmatpush3.bf16.xpose.msk.msra.mxu1 %vm499_vm1, %v411_v53 }
  0x44   :  { %363 = vmatmul.mubr.msk.f32.vlgmr.msra.gmra.mrb[0].mxu0 %vm52_vm0, %v539_v17  ;;  %365 = vmatmul.mubr.msk.f32.vlgmr.msra.gmra.mrb[0].mxu1 %vm52_vm0, %v544_v18 }
  0x8f   :  { %v238_v56 = vpop.permute.xlu0 %237 }
  0x90   :  { %v256_v1 = vadd.f32 %v249_v60, %v238_v56  ;;  %v257_v7 = vadd.f32 %v253_v61, %v238_v56 }
  0x93   :  { %v243_v62 = vpop.permute.xlu0 %242 }
  0x94   :  { %v258_v2 = vadd.f32 %v249_v60, %v243_v62  ;;  %v259_v8 = vadd.f32 %v253_v61, %v243_v62 }
 0x117   :  { %v221_v63 = vpop.f32.mrb[0].mxu0  ;;  %v227_v0 = vpop.f32.mrb[0].mxu1 }
 0x118   :  { %v260_v3 = vmul.f32 2.0, %v221_v63  ;;  %v262_v4 = vmul.f32 2.0, %v227_v0  ;;  %v223_v5 = vpop.f32.mrb[1].mxu0  ;;  %v229_v6 = vpop.f32.mrb[1].mxu1 }
 0x119   :  { %v261_v9 = vmul.f32 2.0, %v223_v5  ;;  %v263_v10 = vmul.f32 2.0, %v229_v6 }
 0x11a   :  { %v264_v11 = vsub.f32 %v256_v1, %v260_v3  ;;  %v266_v12 = vsub.f32 %v258_v2, %v262_v4 }
 0x11b   :  { %v265_v13 = vsub.f32 %v257_v7, %v261_v9  ;;  %v267_v14 = vsub.f32 %v259_v8, %v263_v10 }
 0x11c   :  { %v268_v15 = vmul.f32 0.03125, %v264_v11  ;;  %v270_v16 = vmul.f32 0.03125, %v266_v12 }
 0x11d   :  { %v269_v17 = vmul.f32 0.03125, %v265_v13  ;;  %v271_v18 = vmul.f32 0.03125, %v267_v14 }
 0x11e   :  { %v272_v19 = vmax.f32 %v268_v15, 0.0  ;;  %v274_v20 = vmax.f32 %v270_v16, 0.0 }
 0x11f   :  { %v273_v21 = vmax.f32 %v269_v17, 0.0  ;;  %v275_v22 = vmax.f32 %v271_v18, 0.0 }
 0x120   :  { %276 = vst [vmem:[#allocation2] sm:$0xff] %v272_v19  ;;  %278 = vst [vmem:[#allocation2 + $0x10] sm:$0xff] %v274_v20 }
 0x121   :  { %277 = vst [vmem:[#allocation2 + $0x8] sm:$0xff] %v273_v21  ;;  %279 = vst [vmem:[#allocation2 + $0x18] sm:$0xff] %v275_v22 }
 0x122   :  { %446 = shalt.err (!%p443_p4)
}
 0x123   :  { %s447_s10 = scalar_lea.hbm %s697_s4, 512 }
 0x124   :  { %p448_p5 = scmp.ne.s32.totalorder %s697_s4, %s447_s10  ;;  %p451_p6 = scmp.lt.u32.totalorder %s447_s10, %s697_s4 }
 0x126   :  { %p453_p7 = pnand %p451_p6, %p448_p5 }
 0x128   :  { %456 = shalt.err (!%p453_p7)
}
 0x129   :  { %s461_s15 = smov 256   ;;  %s462_s0 = smov 16  }
 0x12a   :  { %291 = dma.vmem_to_hbm [thread:$0]  %s286_s3, 512, %s697_s4, [#allocation3], %s461_s15, %s461_s15, %s462_s0  }
 0x12b   :  { %457 = dma.done.wait [#allocation3], 512  }
 0x12c   :  { %458 = vsyncadd [#allocation3], 4294966784 }
 0x12d   :  { %295 = vsyncpa [#allocation3], 1 }

</bundles_post_ra>
